<compile_context>
chip_gen: v7x
topology: tpu7x:2x2x1
jax: 0.10.0
libtpu: 0.0.40
codegen_flags: <defaults>
</compile_context>

<pallas_src>
import functools

import jax
import jax.numpy as jnp
from jax import lax
from jax.experimental import pallas as pl
from jax.experimental.pallas import tpu as pltpu


def _round_up(x, m):
    return ((x + m - 1) // m) * m


def _gelu_exact(x):
    # PyTorch nn.GELU() default ("none" approximation) = 0.5*x*(1+erf(x/sqrt(2)))
    return 0.5 * x * (1.0 + lax.erf(x * 0.7071067811865475))


def _ff_kernel(x_ref, w1g_ref, w1v_ref, b1g_ref, b1v_ref, w2_ref, b2_ref,
               o_ref, acc_ref):
    # Grid: (row tiles, hidden tiles).  Hidden axis is the reduction for the
    # second matmul; acc_ref is the resident f32 accumulator (tm, dim_p).
    h_step = pl.program_id(1)

    x = x_ref[...]
    hg = jnp.dot(x, w1g_ref[...], preferred_element_type=jnp.float32) \
        + b1g_ref[...]
    hv = jnp.dot(x, w1v_ref[...], preferred_element_type=jnp.float32) \
        + b1v_ref[...]
    g = _gelu_exact(hg) * hv
    partial = jnp.dot(g.astype(w2_ref.dtype), w2_ref[...],
                      preferred_element_type=jnp.float32)

    @pl.when(h_step == 0)
    def _():
        # Fold the output bias into the initialization; avoids a separate
        # zero-fill pass and a separate bias-add pass at finalize.
        acc_ref[...] = partial + b2_ref[...]

    @pl.when(h_step > 0)
    def _():
        acc_ref[...] += partial

    @pl.when(h_step == pl.num_programs(1) - 1)
    def _():
        o_ref[...] = acc_ref[...].astype(o_ref.dtype)


@functools.partial(jax.jit, static_argnames=("tm", "th", "matmul_dtype"))
def feed_forward(x, w1, b1, w2, b2, *, tm=256, th=512, matmul_dtype=None):
    """x: [..., dim] -> [..., dim].  w1: (dim, 2H), b1: (2H,), w2: (H, dim)."""
    orig_shape = x.shape
    dim = orig_shape[-1]
    rows = 1
    for s in orig_shape[:-1]:
        rows *= s

    hidden = w2.shape[0]
    assert w1.shape == (dim, 2 * hidden)

    # --- tile sizing (lane-dense, padded) -------------------------------
    dim_p = _round_up(dim, 128)
    th_eff = min(th, _round_up(hidden, 128))          # hidden tile
    hidden_p = _round_up(hidden, th_eff)
    tm_eff = min(tm, _round_up(rows, 8))              # row tile
    rows_p = _round_up(rows, tm_eff)
    n_row = rows_p // tm_eff
    n_h = hidden_p // th_eff

    # --- wrapper-side split + zero padding ------------------------------
    x2 = x.reshape(rows, dim)
    x2 = jnp.pad(x2, ((0, rows_p - rows), (0, dim_p - dim)))
    w1g = jnp.pad(w1[:, :hidden], ((0, dim_p - dim), (0, hidden_p - hidden)))
    w1v = jnp.pad(w1[:, hidden:], ((0, dim_p - dim), (0, hidden_p - hidden)))
    b1g = jnp.pad(b1[:hidden], (0, hidden_p - hidden)).reshape(1, hidden_p)
    b1v = jnp.pad(b1[hidden:], (0, hidden_p - hidden)).reshape(1, hidden_p)
    w2p = jnp.pad(w2, ((0, hidden_p - hidden), (0, dim_p - dim)))
    b2p = jnp.pad(b2, (0, dim_p - dim)).reshape(1, dim_p)

    if matmul_dtype is not None:
        # bf16 MXU operands (v6e/v7x peak); accumulation stays f32.
        x2 = x2.astype(matmul_dtype)
        w1g = w1g.astype(matmul_dtype)
        w1v = w1v.astype(matmul_dtype)
        w2p = w2p.astype(matmul_dtype)

    # --- cost estimate ---------------------------------------------------
    itm = jnp.dtype(x.dtype).itemsize
    wdt = jnp.dtype(w2p.dtype).itemsize
    flops = 6 * rows_p * dim_p * hidden_p
    bytes_accessed = (
        rows_p * dim_p * itm                       # x
        + (3 * dim_p * hidden_p) * wdt             # w1g, w1v, w2
        + (2 * hidden_p + dim_p) * jnp.dtype(b1.dtype).itemsize
        + rows_p * dim_p * jnp.dtype(x.dtype).itemsize)  # out

    out = pl.pallas_call(
        _ff_kernel,
        out_shape=jax.ShapeDtypeStruct((rows_p, dim_p), x.dtype),
        grid_spec=pltpu.PrefetchScalarGridSpec(
            num_scalar_prefetch=0,
            grid=(n_row, n_h),
            in_specs=[
                pl.BlockSpec((tm_eff, dim_p), lambda i, j: (i, 0)),   # x tile
                pl.BlockSpec((dim_p, th_eff), lambda i, j: (0, j)),   # W1 gate
                pl.BlockSpec((dim_p, th_eff), lambda i, j: (0, j)),   # W1 value
                pl.BlockSpec((1, th_eff), lambda i, j: (0, j)),       # b1 gate
                pl.BlockSpec((1, th_eff), lambda i, j: (0, j)),       # b1 value
                pl.BlockSpec((th_eff, dim_p), lambda i, j: (j, 0)),   # W2 tile
                pl.BlockSpec((1, dim_p), lambda i, j: (0, 0)),        # b2
            ],
            out_specs=pl.BlockSpec((tm_eff, dim_p), lambda i, j: (i, 0)),
            scratch_shapes=[pltpu.VMEM((tm_eff, dim_p), jnp.float32)],
        ),
        compiler_params=pltpu.CompilerParams(
            dimension_semantics=("parallel", "arbitrary"),
            vmem_limit_bytes=64 * 1024 * 1024,
        ),
        cost_estimate=pl.CostEstimate(
            flops=flops,
            transcendentals=rows_p * hidden_p,
            bytes_accessed=int(bytes_accessed)),
    )(x2, w1g, w1v, b1g, b1v, w2p, b2p)

    return out[:rows, :dim].reshape(orig_shape)


def _init_params(key, dim, hidden_dim, dtype=jnp.float32):
    """Deterministic xavier-uniform-style init (shapes match nn.Linear)."""
    k1, k2 = jax.random.split(key)
    lim1 = (6.0 / (dim + hidden_dim * 2)) ** 0.5
    w1 = jax.random.uniform(k1, (dim, hidden_dim * 2), dtype, -lim1, lim1)
    b1 = jnp.zeros((hidden_dim * 2,), dtype)
    lim2 = (6.0 / (hidden_dim + dim)) ** 0.5
    w2 = jax.random.uniform(k2, (hidden_dim, dim), dtype, -lim2, lim2)
    b2 = jnp.zeros((dim,), dtype)
    return w1, b1, w2, b2


def _reference(x, w1, b1, w2, b2):
    h = x @ w1 + b1
    hidden = h.shape[-1] // 2
    g = _gelu_exact(h[..., :hidden]) * h[..., hidden:]
    return g @ w2 + b2


if __name__ == "__main__":
    key = jax.random.PRNGKey(0)
    k_x, k_p, k_x2, k_p2 = jax.random.split(key, 4)

    # Test 1: small shape from the module spec (single tile after padding).
    batch, seq, dim, hidden_dim = 2, 8, 32, 32
    x = jax.random.normal(k_x, (batch, seq, dim), jnp.float32)
    w1, b1, w2, b2 = _init_params(k_p, dim, hidden_dim)
    y = jax.block_until_ready(feed_forward(x, w1, b1, w2, b2))
    y_ref = _reference(x, w1, b1, w2, b2)
    assert y.shape == x.shape
    assert jnp.allclose(y, y_ref, atol=1e-4, rtol=1e-4), "mismatch (test 1)"

    # Test 2: non-aligned shapes exercising padding + multi-tile grid
    # (rows=400 -> 4 row tiles of 128; hidden=160 -> 2 hidden tiles of 128).
    batch, seq, dim, hidden_dim = 4, 100, 192, 160
    x2i = jax.random.normal(k_x2, (batch, seq, dim), jnp.float32)
    w1b, b1b, w2b, b2b = _init_params(k_p2, dim, hidden_dim)
    b1b = b1b + 0.01
    b2b = b2b - 0.02
    y2 = jax.block_until_ready(
        feed_forward(x2i, w1b, b1b, w2b, b2b, tm=128, th=128))
    y2_ref = _reference(x2i, w1b, b1b, w2b, b2b)
    assert y2.shape == x2i.shape
    assert jnp.allclose(y2, y2_ref, atol=1e-4, rtol=1e-4), "mismatch (test 2)"

    print("KERNEL_OK")
</pallas_src>

<mosaic_0001>
module attributes {stable_mosaic.version = 11 : i64} {
  func.func @_ff_kernel(%arg0: i32, %arg1: i32, %arg2: memref<16x128xf32, #tpu.memory_space<vmem>>, %arg3: memref<128x128xf32, #tpu.memory_space<vmem>>, %arg4: memref<128x128xf32, #tpu.memory_space<vmem>>, %arg5: memref<1x128xf32, #tpu.memory_space<vmem>>, %arg6: memref<1x128xf32, #tpu.memory_space<vmem>>, %arg7: memref<128x128xf32, #tpu.memory_space<vmem>>, %arg8: memref<1x128xf32, #tpu.memory_space<vmem>>, %arg9: memref<16x128xf32, #tpu.memory_space<vmem>>, %arg10: memref<16x128xf32, #tpu.memory_space<vmem>>) attributes {dimension_semantics = [#tpu.dimension_semantics<parallel>, #tpu.dimension_semantics<arbitrary>], iteration_bounds = array<i64: 1, 1>, scalar_prefetch = 0 : i64, scratch_operands = 1 : i64, tpu.core_type = #tpu.core_type<tc>, window_params = [{transform_indices = @transform_0, window_bounds = array<i64: 16, 128>}, {transform_indices = @transform_1, window_bounds = array<i64: 128, 128>}, {transform_indices = @transform_2, window_bounds = array<i64: 128, 128>}, {transform_indices = @transform_3, window_bounds = array<i64: 1, 128>}, {transform_indices = @transform_4, window_bounds = array<i64: 1, 128>}, {transform_indices = @transform_5, window_bounds = array<i64: 128, 128>}, {pipeline_mode = #tpu.pipeline_mode<synchronous>, transform_indices = @transform_6, window_bounds = array<i64: 1, 128>}, {transform_indices = @transform_7, window_bounds = array<i64: 16, 128>}]} {
    %c0 = arith.constant 0 : index
    %c0_0 = arith.constant 0 : index
    %0 = vector.load %arg2[%c0, %c0_0] : memref<16x128xf32, #tpu.memory_space<vmem>>, vector<16x128xf32>
    %c0_1 = arith.constant 0 : index
    %c0_2 = arith.constant 0 : index
    %1 = vector.load %arg3[%c0_1, %c0_2] : memref<128x128xf32, #tpu.memory_space<vmem>>, vector<128x128xf32>
    %cst = arith.constant dense<0.000000e+00> : vector<16x128xf32>
    %2 = tpu.matmul %0, %1, %cst {dimension_numbers = #tpu.dot_dimension_numbers<[1], [0], [0], [1], [0, 0, 1, 1], [], []>} : vector<16x128xf32>, vector<128x128xf32>, vector<16x128xf32> -> vector<16x128xf32>
    %c0_3 = arith.constant 0 : index
    %c0_4 = arith.constant 0 : index
    %3 = vector.load %arg5[%c0_3, %c0_4] : memref<1x128xf32, #tpu.memory_space<vmem>>, vector<1x128xf32>
    %4 = vector.broadcast %3 : vector<1x128xf32> to vector<16x128xf32>
    %5 = arith.addf %2, %4 : vector<16x128xf32>
    %c0_5 = arith.constant 0 : index
    %c0_6 = arith.constant 0 : index
    %6 = vector.load %arg4[%c0_5, %c0_6] : memref<128x128xf32, #tpu.memory_space<vmem>>, vector<128x128xf32>
    %cst_7 = arith.constant dense<0.000000e+00> : vector<16x128xf32>
    %7 = tpu.matmul %0, %6, %cst_7 {dimension_numbers = #tpu.dot_dimension_numbers<[1], [0], [0], [1], [0, 0, 1, 1], [], []>} : vector<16x128xf32>, vector<128x128xf32>, vector<16x128xf32> -> vector<16x128xf32>
    %c0_8 = arith.constant 0 : index
    %c0_9 = arith.constant 0 : index
    %8 = vector.load %arg6[%c0_8, %c0_9] : memref<1x128xf32, #tpu.memory_space<vmem>>, vector<1x128xf32>
    %9 = vector.broadcast %8 : vector<1x128xf32> to vector<16x128xf32>
    %10 = arith.addf %7, %9 : vector<16x128xf32>
    %cst_10 = arith.constant 5.000000e-01 : f32
    %11 = vector.broadcast %cst_10 : f32 to vector<16x128xf32>
    %12 = arith.mulf %11, %5 : vector<16x128xf32>
    %cst_11 = arith.constant 0.707106769 : f32
    %13 = vector.broadcast %cst_11 : f32 to vector<16x128xf32>
    %14 = arith.mulf %5, %13 : vector<16x128xf32>
    %15 = math.erf %14 : vector<16x128xf32>
    %cst_12 = arith.constant 1.000000e+00 : f32
    %16 = vector.broadcast %cst_12 : f32 to vector<16x128xf32>
    %17 = arith.addf %16, %15 : vector<16x128xf32>
    %18 = arith.mulf %12, %17 : vector<16x128xf32>
    %19 = arith.mulf %18, %10 : vector<16x128xf32>
    %c0_13 = arith.constant 0 : index
    %c0_14 = arith.constant 0 : index
    %20 = vector.load %arg7[%c0_13, %c0_14] : memref<128x128xf32, #tpu.memory_space<vmem>>, vector<128x128xf32>
    %cst_15 = arith.constant dense<0.000000e+00> : vector<16x128xf32>
    %21 = tpu.matmul %19, %20, %cst_15 {dimension_numbers = #tpu.dot_dimension_numbers<[1], [0], [0], [1], [0, 0, 1, 1], [], []>} : vector<16x128xf32>, vector<128x128xf32>, vector<16x128xf32> -> vector<16x128xf32>
    %c0_i32 = arith.constant 0 : i32
    %22 = arith.cmpi eq, %arg1, %c0_i32 : i32
    %23 = arith.extui %22 : i1 to i32
    %c0_i32_16 = arith.constant 0 : i32
    %24 = arith.cmpi ne, %23, %c0_i32_16 : i32
    scf.if %24 {
      %c0_21 = arith.constant 0 : index
      %c0_22 = arith.constant 0 : index
      %31 = vector.load %arg8[%c0_21, %c0_22] : memref<1x128xf32, #tpu.memory_space<vmem>>, vector<1x128xf32>
      %32 = vector.broadcast %31 : vector<1x128xf32> to vector<16x128xf32>
      %33 = arith.addf %21, %32 : vector<16x128xf32>
      %c0_23 = arith.constant 0 : index
      %c0_24 = arith.constant 0 : index
      %34 = vector.load %arg10[%c0_23, %c0_24] : memref<16x128xf32, #tpu.memory_space<vmem>>, vector<16x128xf32>
      tpu.vector_store %arg10[%c0_23, %c0_24], %33 {strides = array<i32>} : memref<16x128xf32, #tpu.memory_space<vmem>>, vector<16x128xf32>,
    } else {
    }
    %c0_i32_17 = arith.constant 0 : i32
    %25 = arith.cmpi sgt, %arg1, %c0_i32_17 : i32
    %26 = arith.extui %25 : i1 to i32
    %c0_i32_18 = arith.constant 0 : i32
    %27 = arith.cmpi ne, %26, %c0_i32_18 : i32
    scf.if %27 {
      %c0_21 = arith.constant 0 : index
      %c0_22 = arith.constant 0 : index
      %31 = vector.load %arg10[%c0_21, %c0_22] : memref<16x128xf32, #tpu.memory_space<vmem>>, vector<16x128xf32>
      %32 = arith.addf %31, %21 : vector<16x128xf32>
      %c0_23 = arith.constant 0 : index
      %c0_24 = arith.constant 0 : index
      %33 = vector.load %arg10[%c0_23, %c0_24] : memref<16x128xf32, #tpu.memory_space<vmem>>, vector<16x128xf32>
      tpu.vector_store %arg10[%c0_23, %c0_24], %32 {strides = array<i32>} : memref<16x128xf32, #tpu.memory_space<vmem>>, vector<16x128xf32>,
    } else {
    }
    %c0_i32_19 = arith.constant 0 : i32
    %28 = arith.cmpi eq, %arg1, %c0_i32_19 : i32
    %29 = arith.extui %28 : i1 to i32
    %c0_i32_20 = arith.constant 0 : i32
    %30 = arith.cmpi ne, %29, %c0_i32_20 : i32
    scf.if %30 {
      %c0_21 = arith.constant 0 : index
      %c0_22 = arith.constant 0 : index
      %31 = vector.load %arg10[%c0_21, %c0_22] : memref<16x128xf32, #tpu.memory_space<vmem>>, vector<16x128xf32>
      %c0_23 = arith.constant 0 : index
      %c0_24 = arith.constant 0 : index
      %32 = vector.load %arg9[%c0_23, %c0_24] : memref<16x128xf32, #tpu.memory_space<vmem>>, vector<16x128xf32>
      tpu.vector_store %arg9[%c0_23, %c0_24], %31 {strides = array<i32>} : memref<16x128xf32, #tpu.memory_space<vmem>>, vector<16x128xf32>,
    } else {
    }
    return
  }
  func.func @transform_0(%arg0: i32, %arg1: i32) -> (i32, i32) {
    %c0_i32 = arith.constant 0 : i32
    %c0_i32_0 = arith.constant 0 : i32
    return %arg0, %c0_i32 : i32, i32
  }
  func.func @transform_1(%arg0: i32, %arg1: i32) -> (i32, i32) {
    %c0_i32 = arith.constant 0 : i32
    %c0_i32_0 = arith.constant 0 : i32
    return %c0_i32, %arg1 : i32, i32
  }
  func.func @transform_2(%arg0: i32, %arg1: i32) -> (i32, i32) {
    %c0_i32 = arith.constant 0 : i32
    %c0_i32_0 = arith.constant 0 : i32
    return %c0_i32, %arg1 : i32, i32
  }
  func.func @transform_3(%arg0: i32, %arg1: i32) -> (i32, i32) {
    %c0_i32 = arith.constant 0 : i32
    %c0_i32_0 = arith.constant 0 : i32
    return %c0_i32, %arg1 : i32, i32
  }
  func.func @transform_4(%arg0: i32, %arg1: i32) -> (i32, i32) {
    %c0_i32 = arith.constant 0 : i32
    %c0_i32_0 = arith.constant 0 : i32
    return %c0_i32, %arg1 : i32, i32
  }
  func.func @transform_5(%arg0: i32, %arg1: i32) -> (i32, i32) {
    %c0_i32 = arith.constant 0 : i32
    %c0_i32_0 = arith.constant 0 : i32
    return %arg1, %c0_i32 : i32, i32
  }
  func.func @transform_6(%arg0: i32, %arg1: i32) -> (i32, i32) {
    %c0_i32 = arith.constant 0 : i32
    %c0_i32_0 = arith.constant 0 : i32
    %c0_i32_1 = arith.constant 0 : i32
    return %c0_i32, %c0_i32_0 : i32, i32
  }
  func.func @transform_7(%arg0: i32, %arg1: i32) -> (i32, i32) {
    %c0_i32 = arith.constant 0 : i32
    %c0_i32_0 = arith.constant 0 : i32
    return %arg0, %c0_i32 : i32, i32
  }
}

</mosaic_0001>

<bundles_post_ra>
// kernel: feed_forward.1
= control target key start
LH: loop header
LB: loop body
LE: loop exit
PB: predicated region body
PF: predicated region fallthrough
CT: control target
= control target key end

     0   :  { %12 = vsyncpa [#allocation4], 0  ;;  %s1103_s0 = inlined_call_operand.hbm [shape: f32[16,128], index: 0, kind: input, shape index: {}]   ;;  %s1104_s1 = inlined_call_operand.hbm [shape: f32[128,128], index: 1, kind: input, shape index: {}]   ;;  %s1105_s2 = inlined_call_operand.hbm [shape: f32[128,128], index: 2, kind: input, shape index: {}]   ;;  %s1106_s3 = inlined_call_operand.hbm [shape: f32[1,128], index: 3, kind: input, shape index: {}]   ;;  %s1107_s4 = inlined_call_operand.hbm [shape: f32[1,128], index: 4, kind: input, shape index: {}]   ;;  %s1108_s5 = inlined_call_operand.hbm [shape: f32[128,128], index: 5, kind: input, shape index: {}]   ;;  %s1109_s6 = inlined_call_operand.hbm [shape: f32[1,128], index: 6, kind: input, shape index: {}]   ;;  %s1110_s7 = inlined_call_operand.hbm [shape: f32[16,128], index: 7, kind: output, shape index: {}]  }
   0x1   :  { %13 = vsyncpa [#allocation7], 0 }
   0x2   :  { %14 = vsyncpa [#allocation10], 0 }
   0x3   :  { %15 = vsyncpa [#allocation13], 0 }
   0x4   :  { %16 = vsyncpa [#allocation5], 0  ;;  %s927_s24 = smov [#allocation6]   ;;  %s928_s26 = smov [#allocation9]  }
   0x5   :  { %s34_s25 = sshll.u32 %s927_s24, 4  ;;  %s59_s27 = sshll.u32 %s928_s26, 4  ;;  %s35_s25 = int_to_ptr.vmem [resolvable:$true] %s34_s25  ;;  %s977_s27 = int_to_ptr.vmem [resolvable:$true] %s59_s27 }
   0x6   :  { %s741_s30 = scalar_lea.hbm %s1104_s1, 2048 }
   0x7   :  { %p742_p0 = scmp.ne.s32.totalorder %s1104_s1, %s741_s30  ;;  %p745_p1 = scmp.lt.u32.totalorder %s741_s30, %s1104_s1 }
   0x9   :  { %p747_p2 = pnand %p745_p1, %p742_p0 }
   0xb   :  { %750 = shalt.err (!%p747_p2)
}
   0xc   :  { %s751_s12 = scalar_lea.vmem %s35_s25, 2048  ;;  %p756_p4 = scmp.lt.s32.totalorder %s35_s25, %s35_s25 }
   0xd   :  { %p752_p3 = scmp.ne.s32.totalorder %s35_s25, %s751_s12  ;;  %p757_p5 = scmp.lt.s32.totalorder %s751_s12, %s751_s12 }
   0xf   :  { %p758_p6 = por %p757_p5, %p756_p4 }
  0x11   :  { %p759_p7 = pnand %p758_p6, %p752_p3 }
  0x13   :  { %762 = shalt.err (!%p759_p7)
}
  0x14   :  { %s929_s13 = smov 128   ;;  %s930_s14 = smov 8  }
  0x15   :  { %40 = dma.hbm_to_vmem [thread:$0]  %s1104_s1, 2048, %s35_s25, [#allocation7], %s929_s13, %s929_s13, %s930_s14  }
  0x16   :  { %s763_s19 = scalar_lea.hbm %s1106_s3, 16 }
  0x17   :  { %p764_p8 = scmp.ne.s32.totalorder %s1106_s3, %s763_s19  ;;  %p767_p9 = scmp.lt.u32.totalorder %s763_s19, %s1106_s3 }
  0x19   :  { %p769_p10 = pnand %p767_p9, %p764_p8 }
  0x1b   :  { %772 = shalt.err (!%p769_p10)
}
  0x1c   :  { %s773_s24 = scalar_lea.vmem %s977_s27, 16  ;;  %s777_s1 = scalar_lea.vmem %s977_s27, 32 }
  0x1d   :  { %p774_p11 = scmp.ne.s32.totalorder %s977_s27, %s773_s24  ;;  %p778_p12 = scmp.lt.s32.totalorder %s977_s27, %s977_s27 }
  0x1e   :  { %p779_p13 = scmp.lt.s32.totalorder %s777_s1, %s773_s24 }
  0x20   :  { %p780_p0 = por %p779_p13, %p778_p12 }
  0x22   :  { %p781_p1 = pnand %p780_p0, %p774_p11 }
  0x24   :  { %784 = shalt.err (!%p781_p1)
}
  0x25   :  { %62 = dma.hbm_to_vmem [thread:$0]  %s1106_s3, 16, %s977_s27, [#allocation10]  }
  0x26   :  { %s931_s28 = smov [#allocation12]   ;;  %s932_s30 = smov [#allocation3]  }
  0x27   :  { %s78_s29 = sshll.u32 %s931_s28, 4  ;;  %s22_s8 = sshll.u32 %s932_s30, 4  ;;  %s79_s29 = int_to_ptr.vmem [resolvable:$true] %s78_s29  ;;  %s1012_s8 = int_to_ptr.vmem [resolvable:$true] %s22_s8 }
  0x28   :  { %s785_s11 = scalar_lea.hbm %s1108_s5, 2048 }
  0x29   :  { %p786_p2 = scmp.ne.s32.totalorder %s1108_s5, %s785_s11  ;;  %p789_p3 = scmp.lt.u32.totalorder %s785_s11, %s1108_s5 }
  0x2b   :  { %p791_p4 = pnand %p789_p3, %p786_p2 }
  0x2d   :  { %794 = shalt.err (!%p791_p4)
}
  0x2e   :  { %s795_s3 = scalar_lea.vmem %s79_s29, 2048  ;;  %p800_p6 = scmp.lt.s32.totalorder %s79_s29, %s79_s29 }
  0x2f   :  { %p796_p5 = scmp.ne.s32.totalorder %s79_s29, %s795_s3  ;;  %p801_p7 = scmp.lt.s32.totalorder %s795_s3, %s795_s3 }
  0x31   :  { %p802_p8 = por %p801_p7, %p800_p6 }
  0x33   :  { %p803_p9 = pnand %p802_p8, %p796_p5 }
  0x35   :  { %806 = shalt.err (!%p803_p9)
}
  0x36   :  { %84 = dma.hbm_to_vmem [thread:$0]  %s1108_s5, 2048, %s79_s29, [#allocation13], %s929_s13, %s929_s13, %s930_s14  }
  0x37   :  { %s807_s21 = scalar_lea.hbm %s1103_s0, 256 }
  0x38   :  { %p808_p10 = scmp.ne.s32.totalorder %s1103_s0, %s807_s21  ;;  %p811_p11 = scmp.lt.u32.totalorder %s807_s21, %s1103_s0 }
  0x3a   :  { %p813_p12 = pnand %p811_p11, %p808_p10 }
  0x3c   :  { %816 = shalt.err (!%p813_p12)
}
  0x3d   :  { %s817_s25 = scalar_lea.vmem %s1012_s8, 256  ;;  %p822_p0 = scmp.lt.s32.totalorder %s1012_s8, %s1012_s8 }
  0x3e   :  { %p818_p13 = scmp.ne.s32.totalorder %s1012_s8, %s817_s25  ;;  %p823_p1 = scmp.lt.s32.totalorder %s817_s25, %s817_s25 }
  0x40   :  { %p824_p2 = por %p823_p1, %p822_p0 }
  0x42   :  { %p825_p3 = pnand %p824_p2, %p818_p13 }
  0x44   :  { %828 = shalt.err (!%p825_p3)
}
  0x45   :  { %28 = dma.hbm_to_vmem [thread:$0]  %s1103_s0, 256, %s1012_s8, [#allocation4], %s929_s13, %s929_s13, %s930_s14  }
  0x46   :  { %s933_s28 = smov [#allocation8]   ;;  %s934_s30 = smov [#allocation11]  }
  0x47   :  { %s46_s29 = sshll.u32 %s933_s28, 4  ;;  %s69_s9 = sshll.u32 %s934_s30, 4  ;;  %s47_s29 = int_to_ptr.vmem [resolvable:$true] %s46_s29  ;;  %s70_s9 = int_to_ptr.vmem [resolvable:$true] %s69_s9 }
  0x48   :  { %s829_s12 = scalar_lea.hbm %s1105_s2, 2048 }
  0x49   :  { %p830_p4 = scmp.ne.s32.totalorder %s1105_s2, %s829_s12  ;;  %p833_p5 = scmp.lt.u32.totalorder %s829_s12, %s1105_s2 }
  0x4b   :  { %p835_p6 = pnand %p833_p5, %p830_p4 }
  0x4d   :  { %838 = shalt.err (!%p835_p6)
}
  0x4e   :  { %s839_s0 = scalar_lea.vmem %s47_s29, 2048  ;;  %p844_p8 = scmp.lt.s32.totalorder %s47_s29, %s47_s29 }
  0x4f   :  { %p840_p7 = scmp.ne.s32.totalorder %s47_s29, %s839_s0  ;;  %p845_p9 = scmp.lt.s32.totalorder %s839_s0, %s839_s0 }
  0x51   :  { %p846_p10 = por %p845_p9, %p844_p8 }
  0x53   :  { %p847_p11 = pnand %p846_p10, %p840_p7 }
  0x55   :  { %850 = shalt.err (!%p847_p11)
}
  0x56   :  { %52 = dma.hbm_to_vmem [thread:$0]  %s1105_s2, 2048, %s47_s29, [#allocation7], %s929_s13, %s929_s13, %s930_s14  }
  0x57   :  { %s851_s20 = scalar_lea.hbm %s1107_s4, 16 }
  0x58   :  { %p852_p12 = scmp.ne.s32.totalorder %s1107_s4, %s851_s20  ;;  %p855_p13 = scmp.lt.u32.totalorder %s851_s20, %s1107_s4 }
  0x5a   :  { %p857_p0 = pnand %p855_p13, %p852_p12 }
  0x5c   :  { %860 = shalt.err (!%p857_p0)
}
  0x5d   :  { %s861_s1 = scalar_lea.vmem %s70_s9, 16  ;;  %s865_s25 = scalar_lea.vmem %s70_s9, 32 }
  0x5e   :  { %p862_p1 = scmp.ne.s32.totalorder %s70_s9, %s861_s1  ;;  %p866_p2 = scmp.lt.s32.totalorder %s70_s9, %s70_s9 }
  0x5f   :  { %p867_p3 = scmp.lt.s32.totalorder %s865_s25, %s861_s1 }
  0x61   :  { %p868_p4 = por %p867_p3, %p866_p2 }
  0x63   :  { %p869_p5 = pnand %p868_p4, %p862_p1 }
  0x65   :  { %872 = shalt.err (!%p869_p5)
}
  0x66   :  { %72 = dma.hbm_to_vmem [thread:$0]  %s1107_s4, 16, %s70_s9, [#allocation10]  }
  0x67   :  { %s935_s26 = smov [#allocation14]   ;;  %s873_s10 = scalar_lea.hbm %s1109_s6, 16 }
  0x68   :  { %s91_s28 = sshll.u32 %s935_s26, 4  ;;  %p874_p6 = scmp.ne.s32.totalorder %s1109_s6, %s873_s10  ;;  %s92_s28 = int_to_ptr.vmem [resolvable:$true] %s91_s28 }
  0x69   :  { %p877_p7 = scmp.lt.u32.totalorder %s873_s10, %s1109_s6 }
  0x6b   :  { %p879_p8 = pnand %p877_p7, %p874_p6 }
  0x6d   :  { %882 = shalt.err (!%p879_p8)
}
  0x6e   :  { %s883_s17 = scalar_lea.vmem %s92_s28, 16  ;;  %s887_s4 = scalar_lea.vmem %s92_s28, 32 }
  0x6f   :  { %p884_p9 = scmp.ne.s32.totalorder %s92_s28, %s883_s17  ;;  %p888_p10 = scmp.lt.s32.totalorder %s92_s28, %s92_s28 }
  0x70   :  { %p889_p11 = scmp.lt.s32.totalorder %s887_s4, %s883_s17 }
  0x72   :  { %p890_p12 = por %p889_p11, %p888_p10 }
  0x74   :  { %p891_p13 = pnand %p890_p12, %p884_p9 }
  0x76   :  { %894 = shalt.err (!%p891_p13)
}
  0x77   :  { %94 = dma.hbm_to_vmem [thread:$0]  %s1109_s6, 16, %s92_s28, [#allocation13]  }
  0x78   :  { %917 = dma.done.wait [#allocation4], 256  }
  0x79   :  { %918 = vsyncadd [#allocation4], 4294967040 }
  0x7a   :  { %919 = dma.done.wait [#allocation7], 4096  }
  0x7b   :  { %920 = vsyncadd [#allocation7], 4294963200 }
  0x7c   :  { %921 = dma.done.wait [#allocation10], 32  }
  0x7d   :  { %922 = vsyncadd [#allocation10], 4294967264 }
  0x7e   :  { %923 = dma.done.wait [#allocation13], 2064  }
  0x7f   :  { %924 = vsyncadd [#allocation13], 4294965232  ;;  %v118_v0 = vld [vmem:[#allocation6] sm:$0xff]  ;;  %v119_v1 = vld [vmem:[#allocation6 + $0x8] sm:$0xff]  ;;  %s936_s6 = smov [#allocation15]  }
  0x80   :  { %v120_v2 = vld [vmem:[#allocation6 + $0x10] sm:$0xff]  ;;  %v631_v3 = vpack.c.bf16 %v119_v1, %v118_v0  ;;  %v121_v4 = vld [vmem:[#allocation6 + $0x18] sm:$0xff]  ;;  %v122_v6 = vld [vmem:[#allocation6 + $0x20] sm:$0xff]  ;;  %s454_s0 = sshll.u32 %s936_s6, 4  ;;  %s455_s0 = int_to_ptr.vmem [resolvable:$true] %s454_s0 }
  0x81   :  { %v635_v5 = vpack.c.bf16 %v121_v4, %v120_v2  ;;  %v123_v7 = vld [vmem:[#allocation6 + $0x28] sm:$0xff]  ;;  %v216_v8 = vld [vmem:[#allocation8] sm:$0xff]  ;;  %v218_v11 = vld [vmem:[#allocation8 + $0x10] sm:$0xff]  ;;  %s895_s8 = scalar_lea.vmem %s455_s0, 256  ;;  %p900_p1 = scmp.lt.s32.totalorder %s455_s0, %s455_s0 }
  0x82   :  { %632 = vmatprep.subr.bf16.mxu0 %v631_v3  ;;  %v217_v9 = vld [vmem:[#allocation8 + $0x8] sm:$0xff]  ;;  %v639_v12 = vpack.c.bf16 %v123_v7, %v122_v6  ;;  %v124_v13 = vld [vmem:[#allocation6 + $0x30] sm:$0xff]  ;;  %v219_v14 = vld [vmem:[#allocation8 + $0x18] sm:$0xff]  ;;  %p896_p0 = scmp.ne.s32.totalorder %s455_s0, %s895_s8  ;;  %p901_p2 = scmp.lt.s32.totalorder %s895_s8, %s895_s8 }
  0x83   :  { %634 = vmatpush3.bf16.msra.mxu0 %v631_v3  ;;  %v663_v10 = vpack.c.bf16 %v217_v9, %v216_v8  ;;  %v125_v15 = vld [vmem:[#allocation6 + $0x38] sm:$0xff]  ;;  %v667_v16 = vpack.c.bf16 %v219_v14, %v218_v11  ;;  %v220_v17 = vld [vmem:[#allocation8 + $0x20] sm:$0xff]  ;;  %v221_v18 = vld [vmem:[#allocation8 + $0x28] sm:$0xff] }
  0x84   :  { %636 = vmatprep.subr.bf16.mxu0 %v635_v5  ;;  %v671_v19 = vpack.c.bf16 %v221_v18, %v220_v17  ;;  %v116_v20 = vld [vmem:[#allocation3] sm:$0xff]  ;;  %v643_v21 = vpack.c.bf16 %v125_v15, %v124_v13  ;;  %v223_v23 = vld [vmem:[#allocation8 + $0x38] sm:$0xff]  ;;  %v126_v24 = vld [vmem:[#allocation6 + $0x40] sm:$0xff]  ;;  %p902_p3 = por %p901_p2, %p900_p1 }
  0x85   :  { %664 = vmatprep.subr.bf16.mxu1 %v663_v10  ;;  %v222_v22 = vld [vmem:[#allocation8 + $0x30] sm:$0xff]  ;;  %558 = vmatprep.mubr.f32.mxu0 %v116_v20  ;;  %v127_v25 = vld [vmem:[#allocation6 + $0x48] sm:$0xff]  ;;  %v224_v28 = vld [vmem:[#allocation8 + $0x40] sm:$0xff] }
  0x86   :  { %666 = vmatpush3.bf16.msra.mxu1 %v663_v10  ;;  %593 = vmatprep.mubr.f32.mxu1 %v116_v20  ;;  %v675_v26 = vpack.c.bf16 %v223_v23, %v222_v22  ;;  %v647_v27 = vpack.c.bf16 %v127_v25, %v126_v24  ;;  %v225_v29 = vld [vmem:[#allocation8 + $0x48] sm:$0xff]  ;;  %v128_v30 = vld [vmem:[#allocation6 + $0x50] sm:$0xff]  ;;  %v129_v31 = vld [vmem:[#allocation6 + $0x58] sm:$0xff]  ;;  %p903_p4 = pnand %p902_p3, %p896_p0 }
  0x87   :  { %638 = vmatpush3.bf16.msra.mxu0 %v635_v5  ;;  %668 = vmatprep.subr.bf16.mxu1 %v667_v16  ;;  %v679_v32 = vpack.c.bf16 %v225_v29, %v224_v28  ;;  %v651_v33 = vpack.c.bf16 %v129_v31, %v128_v30  ;;  %v226_v34 = vld [vmem:[#allocation8 + $0x50] sm:$0xff]  ;;  %v227_v35 = vld [vmem:[#allocation8 + $0x58] sm:$0xff]  ;;  %v130_v36 = vld [vmem:[#allocation6 + $0x60] sm:$0xff] }
  0x88   :  { %640 = vmatprep.subr.bf16.mxu0 %v639_v12  ;;  %v131_v37 = vld [vmem:[#allocation6 + $0x68] sm:$0xff]  ;;  %v683_v38 = vpack.c.bf16 %v227_v35, %v226_v34  ;;  %v228_v40 = vld [vmem:[#allocation8 + $0x60] sm:$0xff]  ;;  %v132_v42 = vld [vmem:[#allocation6 + $0x70] sm:$0xff] }
  0x89   :  { %v655_v39 = vpack.c.bf16 %v131_v37, %v130_v36  ;;  %v229_v41 = vld [vmem:[#allocation8 + $0x68] sm:$0xff]  ;;  %v133_v43 = vld [vmem:[#allocation6 + $0x78] sm:$0xff]  ;;  %v230_v46 = vld [vmem:[#allocation8 + $0x70] sm:$0xff] }
  0x8a   :  { %670 = vmatpush3.bf16.msra.mxu1 %v667_v16  ;;  %v687_v44 = vpack.c.bf16 %v229_v41, %v228_v40  ;;  %v659_v45 = vpack.c.bf16 %v133_v43, %v132_v42  ;;  %v231_v47 = vld [vmem:[#allocation8 + $0x78] sm:$0xff]  ;;  %v326_v48 = vld [vmem:[#allocation12] sm:$0xff]  ;;  %v327_v49 = vld [vmem:[#allocation12 + $0x8] sm:$0xff] }
  0x8b   :  { %642 = vmatpush3.bf16.msra.mxu0 %v639_v12  ;;  %672 = vmatprep.subr.bf16.mxu1 %v671_v19  ;;  %v691_v50 = vpack.c.bf16 %v231_v47, %v230_v46  ;;  %v695_v51 = vpack.c.bf16 %v327_v49, %v326_v48  ;;  %v328_v52 = vld [vmem:[#allocation12 + $0x10] sm:$0xff]  ;;  %v329_v53 = vld [vmem:[#allocation12 + $0x18] sm:$0xff]  ;;  %v330_v56 = vld [vmem:[#allocation12 + $0x20] sm:$0xff] }
  0x8c   :  { %644 = vmatprep.subr.bf16.mxu0 %v643_v21  ;;  %v117_v54 = vld [vmem:[#allocation3 + $0x8] sm:$0xff]  ;;  %v699_v55 = vpack.c.bf16 %v329_v53, %v328_v52  ;;  %v331_v57 = vld [vmem:[#allocation12 + $0x28] sm:$0xff]  ;;  %v334_v62 = vld [vmem:[#allocation12 + $0x40] sm:$0xff] }
  0x8d   :  { %v703_v58 = vpack.c.bf16 %v331_v57, %v330_v56  ;;  %v332_v59 = vld [vmem:[#allocation12 + $0x30] sm:$0xff]  ;;  %v333_v60 = vld [vmem:[#allocation12 + $0x38] sm:$0xff]  ;;  %v335_v63 = vld [vmem:[#allocation12 + $0x48] sm:$0xff] }
  0x8e   :  { %674 = vmatpush3.bf16.msra.mxu1 %v671_v19  ;;  %v707_v61 = vpack.c.bf16 %v333_v60, %v332_v59  ;;  %v711_v0 = vpack.c.bf16 %v335_v63, %v334_v62  ;;  %v336_v1 = vld [vmem:[#allocation12 + $0x50] sm:$0xff]  ;;  %v337_v2 = vld [vmem:[#allocation12 + $0x58] sm:$0xff]  ;;  %v338_v4 = vld [vmem:[#allocation12 + $0x60] sm:$0xff] }
  0x8f   :  { %646 = vmatpush3.bf16.msra.mxu0 %v643_v21  ;;  %676 = vmatprep.subr.bf16.mxu1 %v675_v26  ;;  %v715_v3 = vpack.c.bf16 %v337_v2, %v336_v1  ;;  %v339_v5 = vld [vmem:[#allocation12 + $0x68] sm:$0xff]  ;;  %v340_v7 = vld [vmem:[#allocation12 + $0x70] sm:$0xff]  ;;  %v341_v8 = vld [vmem:[#allocation12 + $0x78] sm:$0xff] }
  0x90   :  { %648 = vmatprep.subr.bf16.mxu0 %v647_v27  ;;  %v719_v6 = vpack.c.bf16 %v339_v5, %v338_v4  ;;  %v723_v9 = vpack.c.bf16 %v341_v8, %v340_v7  ;;  %v469_v10 = vld [vmem:[#allocation9] ss:$0 sm:$0xff]  ;;  %v470_v19 = vld [vmem:[#allocation11] ss:$0 sm:$0xff] }
  0x92   :  { %678 = vmatpush3.bf16.msra.mxu1 %v675_v26 }
  0x93   :  { %650 = vmatpush3.bf16.msra.mxu0 %v647_v27  ;;  %680 = vmatprep.subr.bf16.mxu1 %v679_v32 }
  0x94   :  { %652 = vmatprep.subr.bf16.mxu0 %v651_v33 }
  0x96   :  { %682 = vmatpush3.bf16.msra.mxu1 %v679_v32  ;;  %v471_v32 = vld [vmem:[#allocation14] ss:$0 sm:$0xff] }
  0x97   :  { %654 = vmatpush3.bf16.msra.mxu0 %v651_v33  ;;  %684 = vmatprep.subr.bf16.mxu1 %v683_v38 }
  0x98   :  { %656 = vmatprep.subr.bf16.mxu0 %v655_v39 }
  0x9a   :  { %686 = vmatpush3.bf16.msra.mxu1 %v683_v38 }
  0x9b   :  { %658 = vmatpush3.bf16.msra.mxu0 %v655_v39  ;;  %688 = vmatprep.subr.bf16.mxu1 %v687_v44 }
  0x9c   :  { %660 = vmatprep.subr.bf16.mxu0 %v659_v45 }
  0x9e   :  { %690 = vmatpush3.bf16.msra.mxu1 %v687_v44 }
  0x9f   :  { %662 = vmatpush3.bf16.msra.mxu0 %v659_v45  ;;  %692 = vmatprep.subr.bf16.mxu1 %v691_v50 }
  0xa0   :  { %696 = vmatprep.subr.bf16.mxu0 %v695_v51 }
  0xa2   :  { %559 = vmatmul.mubr.f32.vlgmr.msra.gmra.mrb[0].mxu0 %v117_v54  ;;  %694 = vmatpush3.bf16.msra.mxu1 %v691_v50 }
  0xa3   :  { %698 = vmatpush3.bf16.msra.mxu0 %v695_v51 }
  0xa4   :  { %700 = vmatprep.subr.bf16.mxu0 %v699_v55 }
  0xa5   :  { %594 = vmatmul.mubr.f32.vlgmr.msra.gmra.mrb[0].mxu1 %v117_v54 }
  0xa7   :  { %702 = vmatpush3.bf16.msra.mxu0 %v699_v55 }
  0xa8   :  { %704 = vmatprep.subr.bf16.mxu0 %v703_v58 }
  0xab   :  { %706 = vmatpush3.bf16.msra.mxu0 %v703_v58 }
  0xac   :  { %708 = vmatprep.subr.bf16.mxu0 %v707_v61 }
  0xaf   :  { %710 = vmatpush3.bf16.msra.mxu0 %v707_v61 }
  0xb0   :  { %712 = vmatprep.subr.bf16.mxu0 %v711_v0 }
  0xb3   :  { %714 = vmatpush3.bf16.msra.mxu0 %v711_v0 }
  0xb4   :  { %716 = vmatprep.subr.bf16.mxu0 %v715_v3 }
  0xb7   :  { %718 = vmatpush3.bf16.msra.mxu0 %v715_v3 }
  0xb8   :  { %720 = vmatprep.subr.bf16.mxu0 %v719_v6 }
  0xbb   :  { %722 = vmatpush3.bf16.msra.mxu0 %v719_v6 }
  0xbc   :  { %724 = vmatprep.subr.bf16.mxu0 %v723_v9 }
  0xbf   :  { %726 = vmatpush3.bf16.msra.mxu0 %v723_v9 }
 0x175   :  { %v560_v11 = vpop.f32.mrb[0].mxu0 }
 0x176   :  { %v213_v12 = vadd.f32 %v560_v11, %v469_v10  ;;  %v207_v13 = vpop.f32.mrb[1].mxu0 }
 0x177   :  { %v208_v14 = vadd.f32 %v469_v10, %v207_v13 }
 0x178   :  { %v317_v15 = vmul.f32 0.70710677, %v213_v12  ;;  %v595_v16 = vpop.f32.mrb[0].mxu1  ;;  %v315_v22 = vmul.f32 0.5, %v213_v12 }
 0x179   :  { %v316_v17 = vmul.f32 0.70710677, %v208_v14  ;;  %v305_v18 = vpop.f32.mrb[1].mxu1  ;;  %v311_v24 = vadd.f32 %v595_v16, %v470_v19  ;;  %v314_v25 = vmul.f32 0.5, %v208_v14 }
 0x17a   :  { %737 = verf.f32 %v317_v15  ;;  %v306_v27 = vadd.f32 %v470_v19, %v305_v18 }
 0x17b   :  { %739 = verf.f32 %v316_v17 }
 0x184   :  { %v738_v20 = vpop.eup %737 }
 0x185   :  { %v740_v21 = vpop.eup %739  ;;  %v321_v23 = vadd.f32 1.0, %v738_v20 }
 0x186   :  { %v320_v26 = vadd.f32 1.0, %v740_v21 }
 0x187   :  { %v323_v28 = vmul.f32 %v321_v23, %v315_v22 }
 0x188   :  { %v322_v29 = vmul.f32 %v320_v26, %v314_v25 }
 0x189   :  { %v325_v30 = vmul.f32 %v323_v28, %v311_v24 }
 0x18a   :  { %v324_v31 = vmul.f32 %v322_v29, %v306_v27 }
 0x18c   :  { %628 = vmatprep.mubr.f32.mxu0 %v324_v31 }
 0x18d   :  { %629 = vmatmul.mubr.f32.vlgmr.msra.gmra.mrb[2].mxu0 %v325_v30 }
 0x260   :  { %v630_v33 = vpop.f32.mrb[2].mxu0 }
 0x261   :  { %v429_v34 = vadd.f32 %v630_v33, %v471_v32  ;;  %v408_v35 = vpop.f32.mrb[3].mxu0 }
 0x262   :  { %v428_v36 = vadd.f32 %v471_v32, %v408_v35 }
 0x263   :  { %448 = vst [vmem:[#allocation15 + $0x8] sm:$0xff] %v429_v34 }
 0x264   :  { %447 = vst [vmem:[#allocation15] sm:$0xff] %v428_v36 }
 0x265   :  { %906 = shalt.err (!%p903_p4)
}
 0x266   :  { %s907_s19 = scalar_lea.hbm %s1110_s7, 256 }
 0x267   :  { %p908_p5 = scmp.ne.s32.totalorder %s1110_s7, %s907_s19  ;;  %p911_p6 = scmp.lt.u32.totalorder %s907_s19, %s1110_s7 }
 0x269   :  { %p913_p7 = pnand %p911_p6, %p908_p5 }
 0x26b   :  { %916 = shalt.err (!%p913_p7)
}
 0x26c   :  { %460 = dma.vmem_to_hbm [thread:$0]  %s455_s0, 256, %s1110_s7, [#allocation5], %s929_s13, %s929_s13, %s930_s14  }
 0x26d   :  { %925 = dma.done.wait [#allocation5], 256  }
 0x26e   :  { %926 = vsyncadd [#allocation5], 4294967040 }
 0x26f   :  { %464 = vsyncpa [#allocation4], 1 }
 0x270   :  { %465 = vsyncpa [#allocation7], 1 }
 0x271   :  { %466 = vsyncpa [#allocation10], 1 }
 0x272   :  { %467 = vsyncpa [#allocation13], 1 }
 0x273   :  { %468 = vsyncpa [#allocation5], 1 }

</bundles_post_ra>
